<compile_context>
chip_gen: v6e
topology: v6e:2x2x1
jax: 0.10.0
libtpu: 0.0.40
codegen_flags: <defaults>
</compile_context>

<pallas_src>
import functools

import jax
import jax.numpy as jnp
from jax.experimental import pallas as pl
from jax.experimental.pallas import tpu as pltpu


def _base_loss_kernel(logits_ref, labels_ref, class_ids_ref, nll_ref, *,
                      block_rows):
    """One row-tile: per-example -log softmax(logits)[y].

    logits_ref:    (BN, C)       input-dtype VMEM tile (blocked over rows)
    labels_ref:    (padded_N, 1) int32, whole array resident in VMEM (one DMA)
    class_ids_ref: (1, C)        int32, whole array resident in VMEM (one DMA)
    nll_ref:       (BN, 1)       f32 per-example loss output tile
    """
    i = pl.program_id(0)

    logits = logits_ref[...].astype(jnp.float32)                      # (BN, C)

    start = pl.multiple_of(i * block_rows, 8)
    labels = labels_ref[pl.ds(start, block_rows), :]                  # (BN, 1)
    class_ids = class_ids_ref[...]                                    # (1, C)

    # Target logit gathered straight from the f32 tile (no one-hot
    # materialized, no dependence on the shifted tile staying live).
    target = jnp.sum(jnp.where(class_ids == labels, logits, 0.0),
                     axis=-1, keepdims=True)                          # (BN, 1)

    # Numerically stable logsumexp.
    row_max = jnp.max(logits, axis=-1, keepdims=True)                 # (BN, 1)
    sumexp = jnp.sum(jnp.exp(logits - row_max), axis=-1, keepdims=True)

    # -log p[y] = logsumexp - logit[y] = log(sumexp) + row_max - logit[y]
    nll_ref[...] = jnp.log(sumexp) + row_max - target


def base_loss(base_logits, base_labels, lambda_base=1.0, block_rows=None):
    """Pallas equivalent of BaseLoss.forward.

    base_logits: (N, C) float array (f32 or bf16)
    base_labels: (N,)   integer class indices
    returns: scalar float32 loss = lambda_base * mean cross-entropy
    """
    n, c = base_logits.shape
    in_itemsize = jnp.dtype(base_logits.dtype).itemsize

    if block_rows is None:
        # Size the tile by the *in-kernel* (f32) working set, not the HBM
        # dtype: 2x double-buffered input tile + ~4 f32-wide (BN, C)
        # temporaries, kept around 20 MiB so it sits comfortably under the
        # 32 MiB scoped-VMEM limit requested below on every generation
        # (v5e 128 MiB phys, v6e 128 MiB, v7x 64 MiB).
        bytes_per_row = c * (2 * in_itemsize + 4 * 4)
        budget = 20 * 1024 * 1024
        bn = budget // max(1, bytes_per_row)
        bn = max(8, min(2048, (bn // 8) * 8))
        n_up = ((n + 7) // 8) * 8
        block_rows = min(bn, max(8, n_up))

    num_tiles = pl.cdiv(n, block_rows)
    padded_n = num_tiles * block_rows

    labels_padded = jnp.zeros((padded_n, 1), jnp.int32).at[:n, 0].set(
        base_labels.astype(jnp.int32))
    class_ids = jnp.arange(c, dtype=jnp.int32).reshape(1, c)

    kernel = functools.partial(_base_loss_kernel, block_rows=block_rows)

    per_example = pl.pallas_call(
        kernel,
        out_shape=jax.ShapeDtypeStruct((padded_n, 1), jnp.float32),
        grid_spec=pltpu.PrefetchScalarGridSpec(
            num_scalar_prefetch=0,
            grid=(num_tiles,),
            in_specs=[
                # Row-blocked logits: auto double-buffered HBM->VMEM pipeline.
                pl.BlockSpec((block_rows, c), lambda i: (i, 0)),
                # Whole labels array, constant block index -> fetched once.
                pl.BlockSpec((padded_n, 1), lambda i: (0, 0)),
                # Grid-invariant class-id iota, fetched once.
                pl.BlockSpec((1, c), lambda i: (0, 0)),
            ],
            out_specs=pl.BlockSpec((block_rows, 1), lambda i: (i, 0)),
        ),
        compiler_params=pltpu.CompilerParams(
            # No carried state -> row tiles are independent; lets Mosaic shard
            # the grid across both TensorCores on v7x.
            dimension_semantics=("parallel",),
            vmem_limit_bytes=32 * 1024 * 1024,
        ),
    )(base_logits, labels_padded, class_ids)

    # Padded rows past N hold block-padding garbage (possibly NaN); slice them
    # away before the reduction. Mean + lambda_base folded into one constant.
    scale = jnp.float32(float(lambda_base) / float(n))
    return jnp.sum(per_example[:n, 0]) * scale


def _ref_loss(logits, labels, lambda_base):
    logp = jax.nn.log_softmax(logits.astype(jnp.float32), axis=-1)
    n = logits.shape[0]
    return -jnp.mean(logp[jnp.arange(n), labels]) * lambda_base


if __name__ == "__main__":
    root = jax.random.PRNGKey(0)
    k1, k2, k3 = jax.random.split(root, 3)

    # Test 1: f32, exact tile (N=8, C=32), non-unit lambda.
    k1l, k1y = jax.random.split(k1)
    logits1 = jax.random.normal(k1l, (8, 32), dtype=jnp.float32)
    labels1 = jax.random.randint(k1y, (8,), 0, 32, dtype=jnp.int32)
    loss1 = jax.block_until_ready(base_loss(logits1, labels1, lambda_base=0.5))
    ref1 = _ref_loss(logits1, labels1, 0.5)
    assert jnp.allclose(loss1, ref1, atol=1e-5, rtol=1e-5), (loss1, ref1)

    # Test 2: f32, partial last tile (N=10, forced BN=8 -> grid=2): exercises
    # multi-tile output blocks and the wrapper-side slice of padded rows.
    k2l, k2y = jax.random.split(k2)
    logits2 = jax.random.normal(k2l, (10, 160), dtype=jnp.float32)
    labels2 = jax.random.randint(k2y, (10,), 0, 160, dtype=jnp.int32)
    loss2 = jax.block_until_ready(
        base_loss(logits2, labels2, lambda_base=1.0, block_rows=8))
    ref2 = _ref_loss(logits2, labels2, 1.0)
    assert jnp.allclose(loss2, ref2, atol=1e-5, rtol=1e-5), (loss2, ref2)

    # Test 3: bf16 logits stay bf16 in HBM, cast to f32 per-tile in-kernel.
    k3l, k3y = jax.random.split(k3)
    logits3 = jax.random.normal(k3l, (16, 128), dtype=jnp.bfloat16)
    labels3 = jax.random.randint(k3y, (16,), 0, 128, dtype=jnp.int32)
    loss3 = jax.block_until_ready(base_loss(logits3, labels3, lambda_base=2.0))
    ref3 = _ref_loss(logits3, labels3, 2.0)
    assert jnp.allclose(loss3, ref3, atol=1e-4, rtol=1e-4), (loss3, ref3)

    print("KERNEL_OK")
</pallas_src>

<mosaic_0001>
module attributes {stable_mosaic.version = 11 : i64} {
  func.func @_base_loss_kernel(%arg0: i32, %arg1: memref<8x32xf32, #tpu.memory_space<vmem>>, %arg2: memref<8x1xi32, #tpu.memory_space<vmem>>, %arg3: memref<1x32xi32, #tpu.memory_space<vmem>>, %arg4: memref<8x1xf32, #tpu.memory_space<vmem>>) attributes {dimension_semantics = [#tpu.dimension_semantics<parallel>], iteration_bounds = array<i64: 1>, scalar_prefetch = 0 : i64, scratch_operands = 0 : i64, tpu.core_type = #tpu.core_type<tc>, window_params = [{transform_indices = @transform_0, window_bounds = array<i64: 8, 32>}, {pipeline_mode = #tpu.pipeline_mode<synchronous>, transform_indices = @transform_1, window_bounds = array<i64: 8, 1>}, {pipeline_mode = #tpu.pipeline_mode<synchronous>, transform_indices = @transform_2, window_bounds = array<i64: 1, 32>}, {transform_indices = @transform_3, window_bounds = array<i64: 8, 1>}]} {
    %c0 = arith.constant 0 : index
    %c0_0 = arith.constant 0 : index
    %0 = vector.load %arg1[%c0, %c0_0] : memref<8x32xf32, #tpu.memory_space<vmem>>, vector<8x32xf32>
    %c8_i32 = arith.constant 8 : i32
    %1 = arith.muli %arg0, %c8_i32 : i32
    %2 = tpu.assume_multiple %1, 8 : i32
    %3 = arith.index_cast %2 : i32 to index
    %c0_1 = arith.constant 0 : index
    %4 = vector.load %arg2[%3, %c0_1] : memref<8x1xi32, #tpu.memory_space<vmem>>, vector<8x1xi32>
    %c0_2 = arith.constant 0 : index
    %c0_3 = arith.constant 0 : index
    %5 = vector.load %arg3[%c0_2, %c0_3] : memref<1x32xi32, #tpu.memory_space<vmem>>, vector<1x32xi32>
    %6 = vector.broadcast %5 : vector<1x32xi32> to vector<8x32xi32>
    %7 = vector.broadcast %4 : vector<8x1xi32> to vector<8x32xi32>
    %8 = arith.cmpi eq, %6, %7 : vector<8x32xi32>
    %cst = arith.constant 0.000000e+00 : f32
    %9 = vector.broadcast %cst : f32 to vector<8x32xf32>
    %10 = arith.select %8, %0, %9 : vector<8x32xi1>, vector<8x32xf32>
    %cst_4 = arith.constant dense<0.000000e+00> : vector<8xf32>
    %11 = vector.multi_reduction <add>, %10, %cst_4 [1] : vector<8x32xf32> to vector<8xf32>
    %12 = vector.shape_cast %11 : vector<8xf32> to vector<8x1xf32>
    %cst_5 = arith.constant dense<0xFF800000> : vector<8xf32>
    %13 = vector.multi_reduction <maximumf>, %0, %cst_5 [1] : vector<8x32xf32> to vector<8xf32>
    %14 = vector.shape_cast %13 : vector<8xf32> to vector<8x1xf32>
    %15 = vector.broadcast %14 : vector<8x1xf32> to vector<8x32xf32>
    %16 = arith.subf %0, %15 : vector<8x32xf32>
    %17 = math.exp %16 : vector<8x32xf32>
    %cst_6 = arith.constant dense<0.000000e+00> : vector<8xf32>
    %18 = vector.multi_reduction <add>, %17, %cst_6 [1] : vector<8x32xf32> to vector<8xf32>
    %19 = vector.shape_cast %18 : vector<8xf32> to vector<8x1xf32>
    %20 = math.log %19 : vector<8x1xf32>
    %21 = arith.addf %20, %14 : vector<8x1xf32>
    %22 = arith.subf %21, %12 : vector<8x1xf32>
    %c0_7 = arith.constant 0 : index
    %c0_8 = arith.constant 0 : index
    %23 = vector.load %arg4[%c0_7, %c0_8] : memref<8x1xf32, #tpu.memory_space<vmem>>, vector<8x1xf32>
    tpu.vector_store %arg4[%c0_7, %c0_8], %22 {strides = array<i32>} : memref<8x1xf32, #tpu.memory_space<vmem>>, vector<8x1xf32>,
    return
  }
  func.func @transform_0(%arg0: i32) -> (i32, i32) {
    %c0_i32 = arith.constant 0 : i32
    %c0_i32_0 = arith.constant 0 : i32
    return %arg0, %c0_i32 : i32, i32
  }
  func.func @transform_1(%arg0: i32) -> (i32, i32) {
    %c0_i32 = arith.constant 0 : i32
    %c0_i32_0 = arith.constant 0 : i32
    %c0_i32_1 = arith.constant 0 : i32
    return %c0_i32, %c0_i32_0 : i32, i32
  }
  func.func @transform_2(%arg0: i32) -> (i32, i32) {
    %c0_i32 = arith.constant 0 : i32
    %c0_i32_0 = arith.constant 0 : i32
    %c0_i32_1 = arith.constant 0 : i32
    return %c0_i32, %c0_i32_0 : i32, i32
  }
  func.func @transform_3(%arg0: i32) -> (i32, i32) {
    %c0_i32 = arith.constant 0 : i32
    %c0_i32_0 = arith.constant 0 : i32
    return %arg0, %c0_i32 : i32, i32
  }
}

</mosaic_0001>

<bundles_post_ra>
// kernel: tpu_custom_call.1
= control target key start
LH: loop header
LB: loop body
LE: loop exit
PB: predicated region body
PF: predicated region fallthrough
CT: control target
= control target key end

     0   :  { %vm28_vm0 = vcmask 261120   ;;  %v58_v1 = vmov 0   ;;  %vm45_vm2 = vcmask 7168   ;;  %s94_s0 = inlined_call_operand.vmem [shape: f32[8,32], index: 0, kind: input, shape index: {}]   ;;  %s95_s1 = inlined_call_operand.vmem [shape: s32[8,1], index: 1, kind: input, shape index: {}]   ;;  %s96_s2 = inlined_call_operand.vmem [shape: s32[1,32], index: 2, kind: input, shape index: {}]   ;;  %s97_s3 = inlined_call_operand.vmem [shape: f32[8,1], index: 3, kind: output, shape index: {}]  }
   0x1   :  { %v14_v0 = vld [vmem:[%s94_s0] sm:$0xff]  ;;  %53 = vset.pattern.permute.xlu0 %v58_v1 }
   0x2   :  { %v32_v2 = vsel %vm28_vm0, %v14_v0, -inf  ;;  %v17_v3 = vld [vmem:[%s95_s1] sm:$0xff] }
   0x3   :  { %33 = vmax.xlane.f32.xlu0 %v32_v2  ;;  %v51_v7 = vld [vmem:[%s96_s2] ss:$0 sm:$0xff] }
  0x19   :  { %24 = vperm.xlu0 %53, %v17_v3  }
  0x8c   :  { %v34_v4 = vpop.xlane.xlu0 %33 }
  0x8d   :  { %v35_v5 = vsub.f32 %v14_v0, %v34_v4 }
  0x8f   :  { %v36_v6 = vmul.f32 1.442695, %v35_v5 }
  0x91   :  { %54 = vpow2.f32 %v36_v6 }
  0x94   :  { %v25_v8 = vpop.permute.xlu0 %24 }
  0x95   :  { %vm26_vm1 = vcmp.eq.s32.totalorder %v51_v7, %v25_v8 }
  0x96   :  { %v27_v10 = vsel %vm26_vm1, %v14_v0, 0.0 }
  0x97   :  { %v29_v12 = vsel %vm28_vm0, %v27_v10, 0.0 }
  0x9e   :  { %v55_v9 = vpop.eup %54 }
  0x9f   :  { %v38_v11 = vsel %vm28_vm0, %v55_v9, 0.0 }
  0xa0   :  { %39 = vadd.xlane.f32.xlu1 %v38_v11 }
  0xa4   :  { %30 = vadd.xlane.f32.xlu1 %v29_v12 }
 0x129   :  { %v40_v13 = vpop.xlane.xlu1 %39 }
 0x12a   :  { %56 = vlog2.f32 %v40_v13 }
 0x12d   :  { %v31_v16 = vpop.xlane.xlu1 %30 }
 0x137   :  { %v57_v14 = vpop.eup %56 }
 0x138   :  { %v42_v15 = vmul.f32 0.6931472, %v57_v14 }
 0x13a   :  { %v43_v17 = vadd.f32 %v42_v15, %v34_v4 }
 0x13c   :  { %v44_v18 = vsub.f32 %v43_v17, %v31_v16 }
 0x13e   :  { %46 = vst.msk [vmem:[%s97_s3] sm:$0xff] %vm45_vm2, %v44_v18 }

</bundles_post_ra>
